<compile_context>
chip_gen: v7x
topology: tpu7x:2x2x1
jax: 0.10.0
libtpu: 0.0.40
codegen_flags: <defaults>
</compile_context>

<pallas_src>
import jax
import jax.numpy as jnp
from jax.experimental import pallas as pl
from jax.experimental.pallas import tpu as pltpu


IN_FEATURES = 53
HIDDEN = 128
OUT_FEATURES = 7
LANE = 128  # TPU lane width; narrow last dims pad to this in VMEM


def _round_up(n, m):
    return ((n + m - 1) // m) * m


def _mlp_kernel(x_ref, w1_ref, b1_ref, w2_ref, b2_ref, o_ref):
    # fc1: (TB, 53) @ (53, 128) + (1, 128) -> ReLU
    h = jnp.dot(x_ref[...], w1_ref[...], preferred_element_type=jnp.float32)
    h = jnp.maximum(h + b1_ref[...], 0.0)
    # fc2: (TB, 128) @ (128, 7) + (1, 7)
    out = jnp.dot(h, w2_ref[...], preferred_element_type=jnp.float32)
    o_ref[...] = (out + b2_ref[...]).astype(o_ref.dtype)


def _choose_tile_rows(batch, block_rows):
    """Row tile: large (amortize per-step overhead) but keep >= ~8 grid steps
    for big batches so v7x's two TensorCores + the DMA pipeline stay busy."""
    tb = min(block_rows, _round_up(batch, 8))
    if batch >= 8 * 512:
        tb = min(tb, max(512, _round_up(pl.cdiv(batch, 8), 8)))
    return tb


def _vmem_limit_bytes(tb):
    """Scoped-VMEM budget for the chosen tile (f32, lane-padded, x2 buffers)."""
    x_tile = tb * LANE * 4          # 53 lanes pad to 128
    o_tile = tb * LANE * 4          # 7 lanes pad to 128
    h_tmp = tb * HIDDEN * 4         # fc1 activation temporary
    weights = (
        _round_up(IN_FEATURES, 8) * HIDDEN * 4   # w1
        + HIDDEN * LANE * 4                       # w2 (7 -> 128 lanes)
        + 2 * LANE * 4                            # biases
    )
    footprint = 2 * (x_tile + o_tile + weights) + h_tmp
    # Headroom for compiler temporaries; cap at 48 MiB (v7x physical VMEM = 64 MiB).
    return int(min(48 << 20, max(16 << 20, footprint + (8 << 20))))


def mlp_forward(x, w1, b1, w2, b2, *, block_rows=4096):
    """x: (B, 53) f32; w1: (53, 128); b1: (128,); w2: (128, 7); b2: (7,)."""
    B = x.shape[0]

    tb = _choose_tile_rows(B, block_rows)
    num_blocks = pl.cdiv(B, tb)

    b1_2d = b1.reshape(1, HIDDEN)
    b2_2d = b2.reshape(1, OUT_FEATURES)

    flops = 2 * B * (IN_FEATURES * HIDDEN + HIDDEN * OUT_FEATURES)
    bytes_accessed = 4 * (
        B * (IN_FEATURES + OUT_FEATURES)
        + IN_FEATURES * HIDDEN + HIDDEN
        + HIDDEN * OUT_FEATURES + OUT_FEATURES
    )

    out = pl.pallas_call(
        _mlp_kernel,
        out_shape=jax.ShapeDtypeStruct((B, OUT_FEATURES), jnp.float32),
        grid=(num_blocks,),
        in_specs=[
            # Batch-tiled activations; 53 == full last dim (no feature padding).
            pl.BlockSpec((tb, IN_FEATURES), lambda i: (i, 0)),
            # Weights / biases: full blocks, constant index map -> VMEM-resident.
            pl.BlockSpec((IN_FEATURES, HIDDEN), lambda i: (0, 0)),
            pl.BlockSpec((1, HIDDEN), lambda i: (0, 0)),
            pl.BlockSpec((HIDDEN, OUT_FEATURES), lambda i: (0, 0)),
            pl.BlockSpec((1, OUT_FEATURES), lambda i: (0, 0)),
        ],
        # Keep the narrow (tb, 7) output: padding it in HBM would multiply
        # write traffic ~18x for a mem-bound kernel. Partial last block rows
        # (B not a multiple of tb) are masked on store.
        out_specs=pl.BlockSpec((tb, OUT_FEATURES), lambda i: (i, 0)),
        compiler_params=pltpu.CompilerParams(
            dimension_semantics=("parallel",),
            vmem_limit_bytes=_vmem_limit_bytes(tb),
        ),
        cost_estimate=pl.CostEstimate(
            flops=flops, transcendentals=0, bytes_accessed=bytes_accessed
        ),
    )(x, w1, b1_2d, w2, b2_2d)

    return out


def init_params(key):
    """Deterministic init matching nn.Linear's U(-1/sqrt(fan_in), 1/sqrt(fan_in))."""
    k1, k2, k3, k4 = jax.random.split(key, 4)
    bound1 = 1.0 / jnp.sqrt(jnp.float32(IN_FEATURES))
    bound2 = 1.0 / jnp.sqrt(jnp.float32(HIDDEN))
    # Stored as (in, out) so the kernel computes x @ W.
    w1 = jax.random.uniform(k1, (IN_FEATURES, HIDDEN), jnp.float32, -bound1, bound1)
    b1 = jax.random.uniform(k2, (HIDDEN,), jnp.float32, -bound1, bound1)
    w2 = jax.random.uniform(k3, (HIDDEN, OUT_FEATURES), jnp.float32, -bound2, bound2)
    b2 = jax.random.uniform(k4, (OUT_FEATURES,), jnp.float32, -bound2, bound2)
    return w1, b1, w2, b2


if __name__ == "__main__":
    key = jax.random.PRNGKey(0)
    k_params, k_x = jax.random.split(key)

    w1, b1, w2, b2 = init_params(k_params)
    batch = 8
    x = jax.random.normal(k_x, (batch, IN_FEATURES), jnp.float32)

    out = mlp_forward(x, w1, b1, w2, b2)
    out = jax.block_until_ready(out)

    # Reference check against plain JAX.
    ref = jnp.maximum(x @ w1 + b1, 0.0) @ w2 + b2
    assert out.shape == (batch, OUT_FEATURES)
    assert jnp.allclose(out, ref, atol=1e-5, rtol=1e-5)

    print("KERNEL_OK")
</pallas_src>

<mosaic_0001>
module attributes {stable_mosaic.version = 11 : i64} {
  func.func @_mlp_kernel(%arg0: i32, %arg1: memref<8x53xf32, #tpu.memory_space<vmem>>, %arg2: memref<53x128xf32, #tpu.memory_space<vmem>>, %arg3: memref<1x128xf32, #tpu.memory_space<vmem>>, %arg4: memref<128x7xf32, #tpu.memory_space<vmem>>, %arg5: memref<1x7xf32, #tpu.memory_space<vmem>>, %arg6: memref<8x7xf32, #tpu.memory_space<vmem>>) attributes {dimension_semantics = [#tpu.dimension_semantics<parallel>], iteration_bounds = array<i64: 1>, scalar_prefetch = 0 : i64, scratch_operands = 0 : i64, tpu.core_type = #tpu.core_type<tc>, window_params = [{transform_indices = @transform_0, window_bounds = array<i64: 8, 53>}, {pipeline_mode = #tpu.pipeline_mode<synchronous>, transform_indices = @transform_1, window_bounds = array<i64: 53, 128>}, {pipeline_mode = #tpu.pipeline_mode<synchronous>, transform_indices = @transform_2, window_bounds = array<i64: 1, 128>}, {pipeline_mode = #tpu.pipeline_mode<synchronous>, transform_indices = @transform_3, window_bounds = array<i64: 128, 7>}, {pipeline_mode = #tpu.pipeline_mode<synchronous>, transform_indices = @transform_4, window_bounds = array<i64: 1, 7>}, {transform_indices = @transform_5, window_bounds = array<i64: 8, 7>}]} {
    %c0 = arith.constant 0 : index
    %c0_0 = arith.constant 0 : index
    %0 = vector.load %arg1[%c0, %c0_0] : memref<8x53xf32, #tpu.memory_space<vmem>>, vector<8x53xf32>
    %c0_1 = arith.constant 0 : index
    %c0_2 = arith.constant 0 : index
    %1 = vector.load %arg2[%c0_1, %c0_2] : memref<53x128xf32, #tpu.memory_space<vmem>>, vector<53x128xf32>
    %cst = arith.constant dense<0.000000e+00> : vector<8x128xf32>
    %2 = tpu.matmul %0, %1, %cst {dimension_numbers = #tpu.dot_dimension_numbers<[1], [0], [0], [1], [0, 0, 1, 1], [], []>} : vector<8x53xf32>, vector<53x128xf32>, vector<8x128xf32> -> vector<8x128xf32>
    %c0_3 = arith.constant 0 : index
    %c0_4 = arith.constant 0 : index
    %3 = vector.load %arg3[%c0_3, %c0_4] : memref<1x128xf32, #tpu.memory_space<vmem>>, vector<1x128xf32>
    %4 = vector.broadcast %3 : vector<1x128xf32> to vector<8x128xf32>
    %5 = arith.addf %2, %4 : vector<8x128xf32>
    %cst_5 = arith.constant 0.000000e+00 : f32
    %6 = vector.broadcast %cst_5 : f32 to vector<8x128xf32>
    %7 = arith.maximumf %5, %6 : vector<8x128xf32>
    %c0_6 = arith.constant 0 : index
    %c0_7 = arith.constant 0 : index
    %8 = vector.load %arg4[%c0_6, %c0_7] : memref<128x7xf32, #tpu.memory_space<vmem>>, vector<128x7xf32>
    %cst_8 = arith.constant dense<0.000000e+00> : vector<8x7xf32>
    %9 = tpu.matmul %7, %8, %cst_8 {dimension_numbers = #tpu.dot_dimension_numbers<[1], [0], [0], [1], [0, 0, 1, 1], [], []>} : vector<8x128xf32>, vector<128x7xf32>, vector<8x7xf32> -> vector<8x7xf32>
    %c0_9 = arith.constant 0 : index
    %c0_10 = arith.constant 0 : index
    %10 = vector.load %arg5[%c0_9, %c0_10] : memref<1x7xf32, #tpu.memory_space<vmem>>, vector<1x7xf32>
    %11 = vector.broadcast %10 : vector<1x7xf32> to vector<8x7xf32>
    %12 = arith.addf %9, %11 : vector<8x7xf32>
    %c0_11 = arith.constant 0 : index
    %c0_12 = arith.constant 0 : index
    %13 = vector.load %arg6[%c0_11, %c0_12] : memref<8x7xf32, #tpu.memory_space<vmem>>, vector<8x7xf32>
    tpu.vector_store %arg6[%c0_11, %c0_12], %12 {strides = array<i32>} : memref<8x7xf32, #tpu.memory_space<vmem>>, vector<8x7xf32>,
    return
  }
  func.func @transform_0(%arg0: i32) -> (i32, i32) {
    %c0_i32 = arith.constant 0 : i32
    %c0_i32_0 = arith.constant 0 : i32
    return %arg0, %c0_i32 : i32, i32
  }
  func.func @transform_1(%arg0: i32) -> (i32, i32) {
    %c0_i32 = arith.constant 0 : i32
    %c0_i32_0 = arith.constant 0 : i32
    %c0_i32_1 = arith.constant 0 : i32
    return %c0_i32, %c0_i32_0 : i32, i32
  }
  func.func @transform_2(%arg0: i32) -> (i32, i32) {
    %c0_i32 = arith.constant 0 : i32
    %c0_i32_0 = arith.constant 0 : i32
    %c0_i32_1 = arith.constant 0 : i32
    return %c0_i32, %c0_i32_0 : i32, i32
  }
  func.func @transform_3(%arg0: i32) -> (i32, i32) {
    %c0_i32 = arith.constant 0 : i32
    %c0_i32_0 = arith.constant 0 : i32
    %c0_i32_1 = arith.constant 0 : i32
    return %c0_i32, %c0_i32_0 : i32, i32
  }
  func.func @transform_4(%arg0: i32) -> (i32, i32) {
    %c0_i32 = arith.constant 0 : i32
    %c0_i32_0 = arith.constant 0 : i32
    %c0_i32_1 = arith.constant 0 : i32
    return %c0_i32, %c0_i32_0 : i32, i32
  }
  func.func @transform_5(%arg0: i32) -> (i32, i32) {
    %c0_i32 = arith.constant 0 : i32
    %c0_i32_0 = arith.constant 0 : i32
    return %arg0, %c0_i32 : i32, i32
  }
}

</mosaic_0001>

<bundles_post_ra>
// kernel: tpu_custom_call.1
= control target key start
LH: loop header
LB: loop body
LE: loop exit
PB: predicated region body
PF: predicated region fallthrough
CT: control target
= control target key end

     0   :  { %v366_v3 = vmov 0.0|0.0   ;;  %vm367_vm0 = vmmov 0   ;;  %v368_v6 = vmov 0.0   ;;  %s490_s0 = inlined_call_operand.vmem [shape: f32[8,53], index: 0, kind: input, shape index: {}]   ;;  %s491_s1 = inlined_call_operand.vmem [shape: f32[53,128], index: 1, kind: input, shape index: {}]   ;;  %s492_s2 = inlined_call_operand.vmem [shape: f32[1,128], index: 2, kind: input, shape index: {}]   ;;  %s493_s3 = inlined_call_operand.vmem [shape: f32[128,7], index: 3, kind: input, shape index: {}]   ;;  %s494_s4 = inlined_call_operand.vmem [shape: f32[1,7], index: 4, kind: input, shape index: {}]   ;;  %s495_s5 = inlined_call_operand.hbm [shape: f32[8,7], index: 5, kind: output, shape index: {}]  }
   0x1   :  { %v22_v0 = vld [vmem:[%s491_s1] sm:$0xff]  ;;  %v23_v1 = vld [vmem:[%s491_s1 + $0x8] sm:$0xff]  ;;  %v24_v2 = vld [vmem:[%s491_s1 + $0x10] sm:$0xff]  ;;  %305 = vmatprep.subr.bf16.mxu0 %v366_v3  ;;  %314 = vmatprep.subr.bf16.mxu1 %v366_v3 }
   0x2   :  { %v306_v4 = vpack.c.bf16 %v23_v1, %v22_v0  ;;  %v25_v5 = vld [vmem:[%s491_s1 + $0x18] sm:$0xff]  ;;  %267 = vmatprep.mubr.msk.f32.mxu0 %vm367_vm0, %v368_v6  ;;  %v115_v7 = vld [vmem:[%s493_s3] sm:$0xff]  ;;  %302 = vmatprep.mubr.msk.f32.mxu1 %vm367_vm0, %v368_v6  ;;  %v116_v9 = vld [vmem:[%s493_s3 + $0x8] sm:$0xff] }
   0x3   :  { %v309_v8 = vpack.c.bf16 %v25_v5, %v24_v2  ;;  %v117_v10 = vld [vmem:[%s493_s3 + $0x10] sm:$0xff]  ;;  %v118_v11 = vld [vmem:[%s493_s3 + $0x18] sm:$0xff]  ;;  %v26_v12 = vld [vmem:[%s491_s1 + $0x20] sm:$0xff]  ;;  %v315_v14 = vpack.c.bf16 %v116_v9, %v115_v7 }
   0x4   :  { %307 = vmatpush3.bf16.msra.mxu0 %v306_v4  ;;  %v27_v13 = vld [vmem:[%s491_s1 + $0x28] sm:$0xff]  ;;  %v318_v15 = vpack.c.bf16 %v118_v11, %v117_v10  ;;  %v119_v17 = vld [vmem:[%s493_s3 + $0x20] sm:$0xff] }
   0x5   :  { %308 = vmatprep.subr.bf16.mxu0 %v366_v3  ;;  %316 = vmatpush3.bf16.msra.mxu1 %v315_v14  ;;  %v312_v16 = vpack.c.bf16 %v27_v13, %v26_v12  ;;  %v120_v18 = vld [vmem:[%s493_s3 + $0x28] sm:$0xff] }
   0x6   :  { %317 = vmatprep.subr.bf16.mxu1 %v366_v3 }
   0x8   :  { %310 = vmatpush3.bf16.msra.mxu0 %v309_v8 }
   0x9   :  { %10 = vsyncpa [#allocation3], 0  ;;  %311 = vmatprep.subr.bf16.mxu0 %v366_v3  ;;  %319 = vmatpush3.bf16.msra.mxu1 %v318_v15  ;;  %v321_v19 = vpack.c.bf16 %v120_v18, %v119_v17  ;;  %v121_v20 = vld [vmem:[%s493_s3 + $0x30] sm:$0xff]  ;;  %v122_v21 = vld [vmem:[%s493_s3 + $0x38] sm:$0xff]  ;;  %vm40_vm1 = vcmask 1044480   ;;  %vm36_vm2 = vcmask 433152  }
   0xa   :  { %320 = vmatprep.subr.bf16.mxu1 %v366_v3  ;;  %v28_v22 = vld [vmem:[%s491_s1 + $0x30] sm:$0x1f]  ;;  %v21_v23 = vld [vmem:[%s490_s0] sm:$0xff]  ;;  %v324_v24 = vpack.c.bf16 %v122_v21, %v121_v20  ;;  %v124_v26 = vld [vmem:[%s493_s3 + $0x48] sm:$0xff]  ;;  %s369_s18 = smov [#allocation2]   ;;  %vm208_vm3 = vcmask 56320  }
   0xb   :  { %v123_v25 = vld [vmem:[%s493_s3 + $0x40] sm:$0xff]  ;;  %v125_v28 = vld [vmem:[%s493_s3 + $0x50] sm:$0xff]  ;;  %v126_v29 = vld [vmem:[%s493_s3 + $0x58] sm:$0xff]  ;;  %s216_s19 = sshll.u32 %s369_s18, 4  ;;  %s217_s19 = int_to_ptr.vmem [resolvable:$true] %s216_s19 }
   0xc   :  { %313 = vmatpush3.bf16.msra.mxu0 %v312_v16  ;;  %v327_v27 = vpack.c.bf16 %v124_v26, %v123_v25  ;;  %v330_v30 = vpack.c.bf16 %v126_v29, %v125_v28  ;;  %v127_v31 = vld [vmem:[%s493_s3 + $0x60] sm:$0xff]  ;;  %v128_v32 = vld [vmem:[%s493_s3 + $0x68] sm:$0xff]  ;;  %v129_v34 = vld [vmem:[%s493_s3 + $0x70] sm:$0xff]  ;;  %p347_p1 = scmp.lt.s32.totalorder %s217_s19, %s217_s19 }
   0xd   :  { %265 = vmatprep.subr.mxu0 %v368_v6  ;;  %322 = vmatpush3.bf16.msra.mxu1 %v321_v19  ;;  %v333_v33 = vpack.c.bf16 %v128_v32, %v127_v31  ;;  %v130_v35 = vld [vmem:[%s493_s3 + $0x78] sm:$0xff]  ;;  %v224_v37 = vld [vmem:[%s492_s2] ss:$0 sm:$0xff]  ;;  %s342_s3 = scalar_lea.vmem %s217_s19, 128 }
   0xe   :  { %323 = vmatprep.subr.bf16.mxu1 %v366_v3  ;;  %v336_v36 = vpack.c.bf16 %v130_v35, %v129_v34  ;;  %v227_v42 = vld [vmem:[%s494_s4] ss:$0 sm:$0xff]  ;;  %p343_p0 = scmp.ne.s32.totalorder %s217_s19, %s342_s3  ;;  %p348_p2 = scmp.lt.s32.totalorder %s342_s3, %s342_s3 }
  0x10   :  { %266 = vmatpush3.msk.msra.mxu0 %vm40_vm1, %v28_v22  ;;  %p349_p3 = por %p348_p2, %p347_p1 }
  0x11   :  { %268 = vmatmul.mubr.msk.f32.vlgmr.msra.gmra.mrb[0].mxu0 %vm36_vm2, %v21_v23  ;;  %325 = vmatpush3.bf16.msra.mxu1 %v324_v24 }
  0x12   :  { %326 = vmatprep.subr.bf16.mxu1 %v366_v3  ;;  %p350_p4 = pnand %p349_p3, %p343_p0 }
  0x15   :  { %328 = vmatpush3.bf16.msra.mxu1 %v327_v27 }
  0x16   :  { %329 = vmatprep.subr.bf16.mxu1 %v366_v3 }
  0x19   :  { %331 = vmatpush3.bf16.msra.mxu1 %v330_v30 }
  0x1a   :  { %332 = vmatprep.subr.bf16.mxu1 %v366_v3 }
  0x1d   :  { %334 = vmatpush3.bf16.msra.mxu1 %v333_v33 }
  0x1e   :  { %335 = vmatprep.subr.bf16.mxu1 %v366_v3 }
  0x21   :  { %337 = vmatpush3.bf16.msra.mxu1 %v336_v36 }
  0xe4   :  { %v110_v38 = vpop.f32.mrb[0].mxu0 }
  0xe5   :  { %v111_v39 = vadd.f32 %v224_v37, %v110_v38  ;;  %v269_v40 = vpop.f32.mrb[1].mxu0 }
  0xe7   :  { %v114_v41 = vmax.f32 %v111_v39, 0.0 }
  0xe9   :  { %303 = vmatmul.mubr.f32.vlgmr.msra.gmra.mrb[0].mxu1 %v114_v41 }
 0x1bc   :  { %v204_v43 = vpop.f32.mrb[0].mxu1 }
 0x1bd   :  { %v205_v44 = vadd.f32 %v227_v42, %v204_v43  ;;  %v304_v45 = vpop.f32.mrb[1].mxu1 }
 0x1bf   :  { %209 = vst.msk [vmem:[#allocation2] sm:$0xff] %vm208_vm3, %v205_v44 }
 0x1c0   :  { %353 = shalt.err (!%p350_p4)
}
 0x1c1   :  { %s354_s21 = scalar_lea.hbm %s495_s5, 128 }
 0x1c2   :  { %p355_p5 = scmp.ne.s32.totalorder %s495_s5, %s354_s21  ;;  %p358_p6 = scmp.lt.u32.totalorder %s354_s21, %s495_s5 }
 0x1c4   :  { %p360_p7 = pnand %p358_p6, %p355_p5 }
 0x1c6   :  { %363 = shalt.err (!%p360_p7)
}
 0x1c7   :  { %219 = dma.vmem_to_hbm [thread:$0]  %s217_s19, 128, %s495_s5, [#allocation3]  }
 0x1c8   :  { %364 = dma.done.wait [#allocation3], 128  }
 0x1c9   :  { %365 = vsyncadd [#allocation3], 4294967168 }
 0x1ca   :  { %223 = vsyncpa [#allocation3], 1 }

</bundles_post_ra>
